<compile_context>
chip_gen: v6e
topology: v6e:2x2x1
jax: 0.10.0
libtpu: 0.0.40
codegen_flags: <defaults>
</compile_context>

<pallas_src>
import functools

import jax
import jax.numpy as jnp
from jax.experimental import pallas as pl
from jax.experimental.pallas import tpu as pltpu


def _round_up(x: int, m: int) -> int:
    return ((x + m - 1) // m) * m


def highway_kernel(x_ref, w_ref, b_ref, o_ref, *, embed: int):
    # x_ref: (tm, E)  f32 input rows (also the skip path)
    # w_ref: (E, 2E)  bf16 fused [W_proj^T | W_gate^T]
    # b_ref: (1, 2E)  f32 fused  [b_proj   | b_gate  ]
    x = x_ref[...]                                    # f32 skip path
    x_mx = x.astype(w_ref.dtype)                      # bf16 operand for MXU

    y = jnp.dot(x_mx, w_ref[...],
                preferred_element_type=jnp.float32) + b_ref[...]

    proj = jnp.maximum(y[:, :embed], 0.0)             # ReLU   (f32, VPU)
    gate = jax.nn.sigmoid(y[:, embed:])               # Sigmoid (f32, EUP)

    # x + g*(p - x) == g*p + (1-g)*x, one fewer VALU op per element
    o_ref[...] = (x + gate * (proj - x)).astype(o_ref.dtype)


def prepare_highway_params(w_proj, b_proj, w_gate, b_gate,
                           *, matmul_dtype=jnp.bfloat16):
    """One-time parameter prep (call OUTSIDE the hot path): transpose the
    nn.Linear (out, in) weights and fuse projection+gate into (E, 2E)/(1, 2E)."""
    E = w_proj.shape[0]
    w_cat = jnp.concatenate([w_proj.T, w_gate.T], axis=1).astype(matmul_dtype)
    b_cat = jnp.concatenate([b_proj, b_gate]).reshape(1, 2 * E).astype(jnp.float32)
    return w_cat, b_cat


def highway_forward(x_lbe, w_cat, b_cat, *, max_tm=512):
    """x_lbe: (L, B, E); w_cat: (E, 2E) fused weight; b_cat: (1, 2E) fused bias."""
    L, B, E = x_lbe.shape
    assert w_cat.shape == (E, 2 * E) and b_cat.shape == (1, 2 * E)

    M = L * B
    # One grid step for small problems; otherwise big row tiles.
    tm = _round_up(M, 8) if M <= max_tm else max_tm
    M_pad = _round_up(M, tm)

    x2d = x_lbe.reshape(M, E)
    if M_pad != M:
        x2d = jnp.pad(x2d, ((0, M_pad - M), (0, 0)))

    kernel = functools.partial(highway_kernel, embed=E)

    out2d = pl.pallas_call(
        kernel,
        out_shape=jax.ShapeDtypeStruct((M_pad, E), x_lbe.dtype),
        grid_spec=pltpu.PrefetchScalarGridSpec(
            num_scalar_prefetch=0,
            grid=(M_pad // tm,),
            in_specs=[
                pl.BlockSpec((tm, E), lambda i: (i, 0)),      # x row tile
                # Fused weight / bias: same block every step (resident).
                # TODO(synk): for very large E on v7x (64 MiB VMEM), consider
                # single-buffering these with pipeline_mode=pl.Buffered(1).
                pl.BlockSpec((E, 2 * E), lambda i: (0, 0)),   # W_cat (bf16)
                pl.BlockSpec((1, 2 * E), lambda i: (0, 0)),   # b_cat (f32)
            ],
            out_specs=pl.BlockSpec((tm, E), lambda i: (i, 0)),
        ),
        compiler_params=pltpu.CompilerParams(
            dimension_semantics=("parallel",)),
    )(x2d, w_cat, b_cat)

    if M_pad != M:
        out2d = out2d[:M]
    return out2d.reshape(L, B, E)


def highway_reference(x_lbe, w_proj, b_proj, w_gate, b_gate):
    """Pure-JAX f32 reference matching the PyTorch forward exactly."""
    proj = jax.nn.relu(jnp.einsum("lbe,oe->lbo", x_lbe, w_proj) + b_proj)
    gate = jax.nn.sigmoid(jnp.einsum("lbe,oe->lbo", x_lbe, w_gate) + b_gate)
    return gate * proj + (1.0 - gate) * x_lbe


if __name__ == "__main__":
    E = 256   # word_embed_size (module default)
    key = jax.random.PRNGKey(0)
    kx, kwp, kbp, kwg, kbg, kx2 = jax.random.split(key, 6)

    bound = 1.0 / (E ** 0.5)
    w_proj = jax.random.uniform(kwp, (E, E), jnp.float32, -bound, bound)
    b_proj = jax.random.uniform(kbp, (E,), jnp.float32, -bound, bound)
    w_gate = jax.random.uniform(kwg, (E, E), jnp.float32, -bound, bound)
    b_gate = jax.random.uniform(kbg, (E,), jnp.float32, -bound, bound)

    # One-time fused / transposed / bf16-cast params (hoisted out of hot path).
    w_cat, b_cat = prepare_highway_params(w_proj, b_proj, w_gate, b_gate)

    # Case 1: shapes implied by the module: (max_sentence_length, batch, E).
    L, B = 8, 4
    x = jax.random.normal(kx, (L, B, E), dtype=jnp.float32)
    out = jax.block_until_ready(highway_forward(x, w_cat, b_cat))
    ref = highway_reference(x, w_proj, b_proj, w_gate, b_gate)
    assert out.shape == (L, B, E)
    # bf16 MXU inputs (f32 accumulation) -> loosened tolerance vs f32 reference.
    assert jnp.allclose(out, ref, atol=3e-2, rtol=3e-2), "mismatch vs reference (case 1)"

    # Case 2: ragged row count (exercises the padding path).
    L2, B2 = 7, 3
    x2 = jax.random.normal(kx2, (L2, B2, E), dtype=jnp.float32)
    out2 = jax.block_until_ready(highway_forward(x2, w_cat, b_cat))
    ref2 = highway_reference(x2, w_proj, b_proj, w_gate, b_gate)
    assert out2.shape == (L2, B2, E)
    assert jnp.allclose(out2, ref2, atol=3e-2, rtol=3e-2), "mismatch vs reference (case 2)"

    print("KERNEL_OK")
</pallas_src>

<mosaic_0001>
module attributes {stable_mosaic.version = 11 : i64} {
  func.func @highway_kernel(%arg0: i32, %arg1: memref<32x256xf32, #tpu.memory_space<vmem>>, %arg2: memref<256x512xbf16, #tpu.memory_space<vmem>>, %arg3: memref<1x512xf32, #tpu.memory_space<vmem>>, %arg4: memref<32x256xf32, #tpu.memory_space<vmem>>) attributes {dimension_semantics = [#tpu.dimension_semantics<parallel>], iteration_bounds = array<i64: 1>, scalar_prefetch = 0 : i64, scratch_operands = 0 : i64, tpu.core_type = #tpu.core_type<tc>, window_params = [{transform_indices = @transform_0, window_bounds = array<i64: 32, 256>}, {pipeline_mode = #tpu.pipeline_mode<synchronous>, transform_indices = @transform_1, window_bounds = array<i64: 256, 512>}, {pipeline_mode = #tpu.pipeline_mode<synchronous>, transform_indices = @transform_2, window_bounds = array<i64: 1, 512>}, {transform_indices = @transform_3, window_bounds = array<i64: 32, 256>}]} {
    %c0 = arith.constant 0 : index
    %c0_0 = arith.constant 0 : index
    %0 = vector.load %arg1[%c0, %c0_0] : memref<32x256xf32, #tpu.memory_space<vmem>>, vector<32x256xf32>
    %1 = arith.truncf %0 : vector<32x256xf32> to vector<32x256xbf16>
    %c0_1 = arith.constant 0 : index
    %c0_2 = arith.constant 0 : index
    %2 = vector.load %arg2[%c0_1, %c0_2] : memref<256x512xbf16, #tpu.memory_space<vmem>>, vector<256x512xbf16>
    %cst = arith.constant dense<0.000000e+00> : vector<32x512xf32>
    %3 = tpu.matmul %1, %2, %cst {dimension_numbers = #tpu.dot_dimension_numbers<[1], [0], [0], [1], [0, 0, 1, 1], [], []>} : vector<32x256xbf16>, vector<256x512xbf16>, vector<32x512xf32> -> vector<32x512xf32>
    %c0_3 = arith.constant 0 : index
    %c0_4 = arith.constant 0 : index
    %4 = vector.load %arg3[%c0_3, %c0_4] : memref<1x512xf32, #tpu.memory_space<vmem>>, vector<1x512xf32>
    %5 = vector.broadcast %4 : vector<1x512xf32> to vector<32x512xf32>
    %6 = arith.addf %3, %5 : vector<32x512xf32>
    %7 = vector.extract_strided_slice %6 {offsets = [0, 0], sizes = [32, 256], strides = [1, 1]} : vector<32x512xf32> to vector<32x256xf32>
    %cst_5 = arith.constant 0.000000e+00 : f32
    %8 = vector.broadcast %cst_5 : f32 to vector<32x256xf32>
    %9 = arith.maximumf %7, %8 : vector<32x256xf32>
    %10 = vector.extract_strided_slice %6 {offsets = [0, 256], sizes = [32, 256], strides = [1, 1]} : vector<32x512xf32> to vector<32x256xf32>
    %11 = arith.negf %10 : vector<32x256xf32>
    %12 = math.exp %11 : vector<32x256xf32>
    %cst_6 = arith.constant 1.000000e+00 : f32
    %13 = vector.broadcast %cst_6 : f32 to vector<32x256xf32>
    %14 = arith.addf %13, %12 : vector<32x256xf32>
    %15 = arith.divf %13, %14 : vector<32x256xf32>
    %16 = arith.subf %9, %0 : vector<32x256xf32>
    %17 = arith.mulf %15, %16 : vector<32x256xf32>
    %18 = arith.addf %0, %17 : vector<32x256xf32>
    %c0_7 = arith.constant 0 : index
    %c0_8 = arith.constant 0 : index
    %19 = vector.load %arg4[%c0_7, %c0_8] : memref<32x256xf32, #tpu.memory_space<vmem>>, vector<32x256xf32>
    tpu.vector_store %arg4[%c0_7, %c0_8], %18 {strides = array<i32>} : memref<32x256xf32, #tpu.memory_space<vmem>>, vector<32x256xf32>,
    return
  }
  func.func @transform_0(%arg0: i32) -> (i32, i32) {
    %c0_i32 = arith.constant 0 : i32
    %c0_i32_0 = arith.constant 0 : i32
    return %arg0, %c0_i32 : i32, i32
  }
  func.func @transform_1(%arg0: i32) -> (i32, i32) {
    %c0_i32 = arith.constant 0 : i32
    %c0_i32_0 = arith.constant 0 : i32
    %c0_i32_1 = arith.constant 0 : i32
    return %c0_i32, %c0_i32_0 : i32, i32
  }
  func.func @transform_2(%arg0: i32) -> (i32, i32) {
    %c0_i32 = arith.constant 0 : i32
    %c0_i32_0 = arith.constant 0 : i32
    %c0_i32_1 = arith.constant 0 : i32
    return %c0_i32, %c0_i32_0 : i32, i32
  }
  func.func @transform_3(%arg0: i32) -> (i32, i32) {
    %c0_i32 = arith.constant 0 : i32
    %c0_i32_0 = arith.constant 0 : i32
    return %arg0, %c0_i32 : i32, i32
  }
}

</mosaic_0001>

<bundles_post_ra>
// kernel: tpu_custom_call.1
= control target key start
LH: loop header
LB: loop body
LE: loop exit
PB: predicated region body
PF: predicated region fallthrough
CT: control target
= control target key end

     0   :  { %8 = vsyncpa [#allocation3], 0  ;;  %s1063_s0 = inlined_call_operand.hbm [shape: f32[32,256], index: 0, kind: input, shape index: {}]   ;;  %s1064_s1 = inlined_call_operand.hbm [shape: bf16[256,512], index: 1, kind: input, shape index: {}]   ;;  %s1065_s2 = inlined_call_operand.hbm [shape: f32[1,512], index: 2, kind: input, shape index: {}]   ;;  %s1066_s3 = inlined_call_operand.hbm [shape: f32[32,256], index: 3, kind: output, shape index: {}]  }
   0x1   :  { %9 = vsyncpa [#allocation6], 0 }
   0x2   :  { %10 = vsyncpa [#allocation4], 0  ;;  %s976_s12 = smov [#allocation5]   ;;  %s977_s14 = smov [#allocation2]  }
   0x3   :  { %s28_s13 = sshll.u32 %s976_s12, 4  ;;  %s16_s15 = sshll.u32 %s977_s14, 4  ;;  %s29_s13 = int_to_ptr.vmem [resolvable:$true] %s28_s13  ;;  %s17_s15 = int_to_ptr.vmem [resolvable:$true] %s16_s15 }
   0x4   :  { %s898_s16 = scalar_lea.vmem %s29_s13, 8192  ;;  %p903_p1 = scmp.lt.s32.totalorder %s29_s13, %s29_s13 }
   0x5   :  { %p899_p0 = scmp.ne.s32.totalorder %s29_s13, %s898_s16  ;;  %p904_p2 = scmp.lt.s32.totalorder %s898_s16, %s898_s16 }
   0x7   :  { %p905_p3 = por %p904_p2, %p903_p1 }
   0x9   :  { %p906_p4 = pnand %p905_p3, %p899_p0 }
   0xb   :  { %909 = shalt.err (!%p906_p4)
}
   0xc   :  { %s978_s17 = smov 256   ;;  %s979_s18 = smov 16  }
   0xd   :  { %34 = dma.hbm_to_vmem [thread:$0]  %s1064_s1, 8192, %s29_s13, [#allocation6], %s978_s17, %s978_s17, %s979_s18  }
   0xe   :  { %s918_s21 = scalar_lea.vmem %s17_s15, 1024  ;;  %p923_p6 = scmp.lt.s32.totalorder %s17_s15, %s17_s15 }
   0xf   :  { %p919_p5 = scmp.ne.s32.totalorder %s17_s15, %s918_s21  ;;  %p924_p7 = scmp.lt.s32.totalorder %s918_s21, %s918_s21 }
  0x11   :  { %p925_p8 = por %p924_p7, %p923_p6 }
  0x13   :  { %p926_p9 = pnand %p925_p8, %p919_p5 }
  0x15   :  { %929 = shalt.err (!%p926_p9)
}
  0x16   :  { %22 = dma.hbm_to_vmem [thread:$0]  %s1063_s0, 1024, %s17_s15, [#allocation3], %s978_s17, %s978_s17, %s979_s18  }
  0x17   :  { %s980_s24 = smov [#allocation7]  }
  0x18   :  { %s41_s25 = sshll.u32 %s980_s24, 4  ;;  %s42_s25 = int_to_ptr.vmem [resolvable:$true] %s41_s25 }
  0x19   :  { %s938_s26 = scalar_lea.vmem %s42_s25, 64  ;;  %p943_p11 = scmp.lt.s32.totalorder %s42_s25, %s42_s25 }
  0x1a   :  { %p939_p10 = scmp.ne.s32.totalorder %s42_s25, %s938_s26  ;;  %p944_p12 = scmp.lt.s32.totalorder %s938_s26, %s938_s26 }
  0x1c   :  { %p945_p13 = por %p944_p12, %p943_p11 }
  0x1e   :  { %p946_p0 = pnand %p945_p13, %p939_p10 }
  0x20   :  { %949 = shalt.err (!%p946_p0)
}
  0x21   :  { %44 = dma.hbm_to_vmem [thread:$0]  %s1065_s2, 64, %s42_s25, [#allocation6]  }
  0x22   :  { %970 = dma.done.wait [#allocation3], 1024  }
  0x23   :  { %971 = vsyncadd [#allocation3], 4294966272 }
  0x24   :  { %972 = dma.done.wait [#allocation6], 8256  }
  0x25   :  { %973 = vsyncadd [#allocation6], 4294959040  ;;  %v762_v0 = vld [vmem:[#allocation5 + $0xec] ss:$16 sps:$4 sm:$0xff]   ;;  %v764_v1 = vld [vmem:[#allocation5 + $0xe8] ss:$16 sps:$4 sm:$0xff]  }
  0x26   :  { %525 = vmatprep.subr.bf16.mxu1 %v762_v0  ;;  %v765_v2 = vld [vmem:[#allocation5 + $0xcc] ss:$16 sps:$4 sm:$0xff]   ;;  %v767_v3 = vld [vmem:[#allocation5 + $0xc8] ss:$16 sps:$4 sm:$0xff]   ;;  %v780_v7 = vld [vmem:[#allocation5 + $0xe4] ss:$16 sps:$4 sm:$0xff]  }
  0x27   :  { %526 = vmatpush1.bf16.msra.mxu1 %v764_v1  ;;  %v768_v4 = vld [vmem:[#allocation5 + $0xac] ss:$16 sps:$4 sm:$0xff]   ;;  %v770_v5 = vld [vmem:[#allocation5 + $0xa8] ss:$16 sps:$4 sm:$0xff]   ;;  %v782_v8 = vld [vmem:[#allocation5 + $0xe0] ss:$16 sps:$4 sm:$0xff]   ;;  %472 = vmatprep.subr.bf16.mxu0 %v780_v7 }
  0x28   :  { %527 = vmatprep.subr.bf16.mxu1 %v765_v2  ;;  %v771_v6 = vld [vmem:[#allocation5 + $0x8c] ss:$16 sps:$4 sm:$0xff]   ;;  %v773_v9 = vld [vmem:[#allocation5 + $0x88] ss:$16 sps:$4 sm:$0xff]   ;;  %473 = vmatpush1.bf16.msra.mxu0 %v782_v8  ;;  %v786_v10 = vld [vmem:[#allocation5 + $0xc4] ss:$16 sps:$4 sm:$0xff]  }
  0x29   :  { %v788_v11 = vld [vmem:[#allocation5 + $0xc0] ss:$16 sps:$4 sm:$0xff]   ;;  %v774_v12 = vld [vmem:[#allocation5 + $0x6c] ss:$16 sps:$4 sm:$0xff]   ;;  %474 = vmatprep.subr.bf16.mxu0 %v786_v10  ;;  %v776_v13 = vld [vmem:[#allocation5 + $0x68] ss:$16 sps:$4 sm:$0xff]  }
  0x2a   :  { %v792_v14 = vld [vmem:[#allocation5 + $0xa4] ss:$16 sps:$4 sm:$0xff]   ;;  %v777_v15 = vld [vmem:[#allocation5 + $0x4c] ss:$16 sps:$4 sm:$0xff]   ;;  %v794_v16 = vld [vmem:[#allocation5 + $0xa0] ss:$16 sps:$4 sm:$0xff]  }
  0x2b   :  { %528 = vmatpush1.bf16.msra.mxu1 %v767_v3  ;;  %v798_v17 = vld [vmem:[#allocation5 + $0x84] ss:$16 sps:$4 sm:$0xff]   ;;  %v779_v18 = vld [vmem:[#allocation5 + $0x48] ss:$16 sps:$4 sm:$0xff]   ;;  %v783_v19 = vld [vmem:[#allocation5 + $0x2c] ss:$16 sps:$4 sm:$0xff]  }
  0x2c   :  { %529 = vmatprep.subr.bf16.mxu1 %v768_v4  ;;  %475 = vmatpush1.bf16.msra.mxu0 %v788_v11  ;;  %v800_v20 = vld [vmem:[#allocation5 + $0x80] ss:$16 sps:$4 sm:$0xff]   ;;  %v804_v21 = vld [vmem:[#allocation5 + $0x64] ss:$16 sps:$4 sm:$0xff]   ;;  %v785_v22 = vld [vmem:[#allocation5 + $0x28] ss:$16 sps:$4 sm:$0xff]  }
  0x2d   :  { %476 = vmatprep.subr.bf16.mxu0 %v792_v14  ;;  %v789_v23 = vld [vmem:[#allocation5 + $0xc] ss:$16 sps:$4 sm:$0xff]   ;;  %v806_v24 = vld [vmem:[#allocation5 + $0x60] ss:$16 sps:$4 sm:$0xff]   ;;  %v810_v25 = vld [vmem:[#allocation5 + $0x44] ss:$16 sps:$4 sm:$0xff]  }
  0x2e   :  { %v791_v26 = vld [vmem:[#allocation5 + $0x8] ss:$16 sps:$4 sm:$0xff]   ;;  %v795_v27 = vld [vmem:[#allocation5 + $0x1ec] ss:$16 sps:$4 sm:$0xff]   ;;  %v812_v28 = vld [vmem:[#allocation5 + $0x40] ss:$16 sps:$4 sm:$0xff]  }
  0x2f   :  { %530 = vmatpush1.bf16.msra.mxu1 %v770_v5  ;;  %v816_v29 = vld [vmem:[#allocation5 + $0x24] ss:$16 sps:$4 sm:$0xff]   ;;  %v797_v30 = vld [vmem:[#allocation5 + $0x1e8] ss:$16 sps:$4 sm:$0xff]   ;;  %v801_v31 = vld [vmem:[#allocation5 + $0x1cc] ss:$16 sps:$4 sm:$0xff]  }
  0x30   :  { %531 = vmatprep.subr.bf16.mxu1 %v771_v6  ;;  %477 = vmatpush1.bf16.msra.mxu0 %v794_v16  ;;  %v818_v32 = vld [vmem:[#allocation5 + $0x20] ss:$16 sps:$4 sm:$0xff]   ;;  %v822_v33 = vld [vmem:[#allocation5 + $0x4] ss:$16 sps:$4 sm:$0xff]   ;;  %v803_v34 = vld [vmem:[#allocation5 + $0x1c8] ss:$16 sps:$4 sm:$0xff]  }
  0x31   :  { %478 = vmatprep.subr.bf16.mxu0 %v798_v17  ;;  %v807_v35 = vld [vmem:[#allocation5 + $0x1ac] ss:$16 sps:$4 sm:$0xff]   ;;  %v824_v36 = vld [vmem:[#allocation5] ss:$16 sps:$4 sm:$0xff]   ;;  %v828_v37 = vld [vmem:[#allocation5 + $0x1e4] ss:$16 sps:$4 sm:$0xff]  }
  0x32   :  { %v1017_v38 = vld [vmem:[#allocation2 + $0x8] sm:$0xff]  ;;  %v1019_v39 = vld [vmem:[#allocation2 + $0x18] sm:$0xff]  ;;  %v830_v42 = vld [vmem:[#allocation5 + $0x1e0] ss:$16 sps:$4 sm:$0xff]   ;;  %s981_s0 = smov [#allocation8]  }
  0x33   :  { %532 = vmatpush1.bf16.msra.mxu1 %v773_v9  ;;  %v63_v40 = vpack.c.bf16 %v1019_v39, %v1017_v38  ;;  %v809_v41 = vld [vmem:[#allocation5 + $0x1a8] ss:$16 sps:$4 sm:$0xff]   ;;  %v813_v43 = vld [vmem:[#allocation5 + $0x18c] ss:$16 sps:$4 sm:$0xff]   ;;  %v834_v44 = vld [vmem:[#allocation5 + $0x1c4] ss:$16 sps:$4 sm:$0xff]  }
  0x34   :  { %533 = vmatprep.subr.bf16.mxu1 %v774_v12  ;;  %479 = vmatpush1.bf16.msra.mxu0 %v800_v20  ;;  %v815_v45 = vld [vmem:[#allocation5 + $0x188] ss:$16 sps:$4 sm:$0xff]   ;;  %v819_v46 = vld [vmem:[#allocation5 + $0x16c] ss:$16 sps:$4 sm:$0xff]   ;;  %v836_v47 = vld [vmem:[#allocation5 + $0x1c0] ss:$16 sps:$4 sm:$0xff]   ;;  %v132_v12 = vlaneseq }
  0x35   :  { %480 = vmatprep.subr.bf16.mxu0 %v804_v21  ;;  %557 = vmatprep.mubr.bf16.mxu1 %v63_v40  ;;  %v840_v48 = vld [vmem:[#allocation5 + $0x1a4] ss:$16 sps:$4 sm:$0xff]   ;;  %v821_v49 = vld [vmem:[#allocation5 + $0x168] ss:$16 sps:$4 sm:$0xff]   ;;  %v842_v50 = vld [vmem:[#allocation5 + $0x1a0] ss:$16 sps:$4 sm:$0xff]  }
  0x36   :  { %504 = vmatprep.mubr.bf16.mxu0 %v63_v40  ;;  %v825_v51 = vld [vmem:[#allocation5 + $0x14c] ss:$16 sps:$4 sm:$0xff]   ;;  %v843_v52 = vld [vmem:[#allocation5 + $0x184] ss:$16 sps:$4 sm:$0xff]   ;;  %v827_v53 = vld [vmem:[#allocation5 + $0x148] ss:$16 sps:$4 sm:$0xff]  }
  0x37   :  { %534 = vmatpush1.bf16.msra.mxu1 %v776_v13  ;;  %v845_v54 = vld [vmem:[#allocation5 + $0x180] ss:$16 sps:$4 sm:$0xff]   ;;  %v831_v55 = vld [vmem:[#allocation5 + $0x12c] ss:$16 sps:$4 sm:$0xff]   ;;  %v846_v56 = vld [vmem:[#allocation5 + $0x164] ss:$16 sps:$4 sm:$0xff]  }
  0x38   :  { %535 = vmatprep.subr.bf16.mxu1 %v777_v15  ;;  %481 = vmatpush1.bf16.msra.mxu0 %v806_v24  ;;  %v833_v57 = vld [vmem:[#allocation5 + $0x128] ss:$16 sps:$4 sm:$0xff]   ;;  %v848_v58 = vld [vmem:[#allocation5 + $0x160] ss:$16 sps:$4 sm:$0xff]   ;;  %v837_v59 = vld [vmem:[#allocation5 + $0x10c] ss:$16 sps:$4 sm:$0xff]  }
  0x39   :  { %482 = vmatprep.subr.bf16.mxu0 %v810_v25  ;;  %v849_v60 = vld [vmem:[#allocation5 + $0x144] ss:$16 sps:$4 sm:$0xff]   ;;  %v839_v61 = vld [vmem:[#allocation5 + $0x108] ss:$16 sps:$4 sm:$0xff]   ;;  %v851_v0 = vld [vmem:[#allocation5 + $0x140] ss:$16 sps:$4 sm:$0xff]  }
  0x3a   :  { %v1023_v62 = vld [vmem:[#allocation2] sm:$0xff]  ;;  %v1025_v63 = vld [vmem:[#allocation2 + $0x10] sm:$0xff]  ;;  %v1027_v1 = vld [vmem:[#allocation2 + $0x28] sm:$0xff]  ;;  %v133_v13 = vshrl.u32 %v132_v12, 7  ;;  %s671_s2 = sshll.u32 %s981_s0, 4  ;;  %s672_s2 = int_to_ptr.vmem [resolvable:$true] %s671_s2 }
  0x3b   :  { %536 = vmatpush1.bf16.msra.mxu1 %v779_v18  ;;  %v1029_v2 = vld [vmem:[#allocation2 + $0x38] sm:$0xff]  ;;  %v852_v3 = vld [vmem:[#allocation5 + $0x124] ss:$16 sps:$4 sm:$0xff]   ;;  %v62_v4 = vpack.c.bf16 %v1025_v63, %v1023_v62  ;;  %v854_v6 = vld [vmem:[#allocation5 + $0x120] ss:$16 sps:$4 sm:$0xff]   ;;  %s950_s28 = scalar_lea.vmem %s672_s2, 1024  ;;  %p955_p2 = scmp.lt.s32.totalorder %s672_s2, %s672_s2 }
  0x3c   :  { %537 = vmatprep.subr.bf16.mxu1 %v783_v19  ;;  %483 = vmatpush1.bf16.msra.mxu0 %v812_v28  ;;  %v65_v5 = vpack.c.bf16 %v1029_v2, %v1027_v1  ;;  %v855_v7 = vld [vmem:[#allocation5 + $0x104] ss:$16 sps:$4 sm:$0xff]   ;;  %v857_v10 = vld [vmem:[#allocation5 + $0x100] ss:$16 sps:$4 sm:$0xff]   ;;  %v142_v14 = vsub.s32 2, %v133_v13  ;;  %v146_v16 = vsub.s32 3, %v133_v13  ;;  %p951_p1 = scmp.ne.s32.totalorder %s672_s2, %s950_s28  ;;  %p956_p3 = scmp.lt.s32.totalorder %s950_s28, %s950_s28 }
  0x3d   :  { %484 = vmatprep.subr.bf16.mxu0 %v816_v29  ;;  %v1035_v8 = vld [vmem:[#allocation2 + $0x20] sm:$0xff]  ;;  %v1037_v9 = vld [vmem:[#allocation2 + $0x30] sm:$0xff] }
  0x3e   :  { %v64_v11 = vpack.c.bf16 %v1037_v9, %v1035_v8  ;;  %v130_v15 = vld [vmem:[#allocation7] sm:$0xf]  ;;  %p957_p4 = por %p956_p3, %p955_p2 }
  0x3f   :  { %538 = vmatpush1.bf16.msra.mxu1 %v785_v22  ;;  %v143_v17 = vrot.slane %v130_v15, %v142_v14  ;;  %v147_v18 = vrot.slane %v130_v15, %v146_v16 }
  0x40   :  { %539 = vmatprep.subr.bf16.mxu1 %v789_v23  ;;  %485 = vmatpush1.bf16.msra.mxu0 %v818_v32  ;;  %p958_p5 = pnand %p957_p4, %p951_p1 }
  0x41   :  { %486 = vmatprep.subr.bf16.mxu0 %v822_v33 }
  0x43   :  { %540 = vmatpush1.bf16.msra.mxu1 %v791_v26 }
  0x44   :  { %541 = vmatprep.subr.bf16.mxu1 %v795_v27  ;;  %487 = vmatpush1.bf16.msra.mxu0 %v824_v36 }
  0x45   :  { %488 = vmatprep.subr.bf16.mxu0 %v828_v37 }
  0x47   :  { %542 = vmatpush2.bf16.msra.mxu1 %v797_v30 }
  0x48   :  { %543 = vmatprep.subr.bf16.mxu1 %v801_v31  ;;  %489 = vmatpush2.bf16.msra.mxu0 %v830_v42 }
  0x49   :  { %490 = vmatprep.subr.bf16.mxu0 %v834_v44 }
  0x4b   :  { %544 = vmatpush2.bf16.msra.mxu1 %v803_v34 }
  0x4c   :  { %545 = vmatprep.subr.bf16.mxu1 %v807_v35  ;;  %491 = vmatpush2.bf16.msra.mxu0 %v836_v47 }
  0x4d   :  { %492 = vmatprep.subr.bf16.mxu0 %v840_v48 }
  0x4f   :  { %546 = vmatpush2.bf16.msra.mxu1 %v809_v41 }
  0x50   :  { %547 = vmatprep.subr.bf16.mxu1 %v813_v43  ;;  %493 = vmatpush2.bf16.msra.mxu0 %v842_v50 }
  0x51   :  { %494 = vmatprep.subr.bf16.mxu0 %v843_v52  ;;  %v138_v52 = vsub.s32 1, %v133_v13 }
  0x53   :  { %548 = vmatpush2.bf16.msra.mxu1 %v815_v45 }
  0x54   :  { %549 = vmatprep.subr.bf16.mxu1 %v819_v46  ;;  %495 = vmatpush2.bf16.msra.mxu0 %v845_v54  ;;  %v134_v46 = vsub.s32 0, %v133_v13 }
  0x55   :  { %496 = vmatprep.subr.bf16.mxu0 %v846_v56 }
  0x57   :  { %550 = vmatpush2.bf16.msra.mxu1 %v821_v49 }
  0x58   :  { %551 = vmatprep.subr.bf16.mxu1 %v825_v51  ;;  %497 = vmatpush2.bf16.msra.mxu0 %v848_v58  ;;  %v135_v51 = vrot.slane %v130_v15, %v134_v46 }
  0x59   :  { %498 = vmatprep.subr.bf16.mxu0 %v849_v60 }
  0x5b   :  { %552 = vmatpush2.bf16.msra.mxu1 %v827_v53 }
  0x5c   :  { %553 = vmatprep.subr.bf16.mxu1 %v831_v55  ;;  %499 = vmatpush2.bf16.msra.mxu0 %v851_v0 }
  0x5d   :  { %500 = vmatprep.subr.bf16.mxu0 %v852_v3 }
  0x5f   :  { %554 = vmatpush2.bf16.msra.mxu1 %v833_v57 }
  0x60   :  { %555 = vmatprep.subr.bf16.mxu1 %v837_v59  ;;  %501 = vmatpush2.bf16.msra.mxu0 %v854_v6  ;;  %v139_v59 = vrot.slane %v130_v15, %v138_v52 }
  0x61   :  { %502 = vmatprep.subr.bf16.mxu0 %v855_v7 }
  0x63   :  { %556 = vmatpush2.bf16.msra.mxu1 %v839_v61 }
  0x64   :  { %503 = vmatpush2.bf16.msra.mxu0 %v857_v10 }
  0x66   :  { %558 = vmatmul.mubr.bf16.vlgmr.msra.gmra.mxu1 %v62_v4 }
  0x67   :  { %567 = vmatprep.mubr.bf16.mxu1 %v65_v5  ;;  %505 = vmatmul.mubr.bf16.vlgmr.msra.gmra.mxu0 %v62_v4 }
  0x68   :  { %514 = vmatprep.mubr.bf16.mxu0 %v65_v5 }
  0x6e   :  { %568 = vmatmul.mubr.bf16.gmra.mxu1 %v64_v11 }
  0x6f   :  { %515 = vmatmul.mubr.bf16.gmra.mxu0 %v64_v11 }
 0x126   :  { %v559_v19 = vpop.f32.mrf.mxu1 }
 0x127   :  { %v560_v20 = vadd.f32 %v559_v19, %v143_v17  ;;  %v506_v31 = vpop.f32.mrf.mxu0 }
 0x128   :  { %v561_v21 = vpop.f32.mrf.mxu1  ;;  %v507_v58 = vadd.f32 %v506_v31, %v135_v51 }
 0x129   :  { %v748_v22 = vmul.f32 -1.442695, %v560_v20  ;;  %v562_v23 = vadd.f32 %v561_v21, %v147_v18  ;;  %v508_v40 = vpop.f32.mrf.mxu0 }
 0x12a   :  { %v563_v24 = vpop.f32.mrf.mxu1  ;;  %v578_v5 = vmax.f32 %v507_v58, 0.0  ;;  %v509_v6 = vadd.f32 %v508_v40, %v139_v59 }
 0x12b   :  { %858 = vpow2.f32 %v748_v22  ;;  %v749_v25 = vmul.f32 -1.442695, %v562_v23  ;;  %v564_v26 = vadd.f32 %v563_v24, %v143_v17  ;;  %v510_v47 = vpop.f32.mrf.mxu0 }
 0x12c   :  { %v565_v27 = vpop.f32.mrf.mxu1  ;;  %v511_v12 = vadd.f32 %v510_v47, %v135_v51  ;;  %v634_v15 = vsub.f32 %v578_v5, %v1023_v62 }
 0x12d   :  { %860 = vpow2.f32 %v749_v25  ;;  %v750_v28 = vmul.f32 -1.442695, %v564_v26  ;;  %v566_v29 = vadd.f32 %v565_v27, %v147_v18  ;;  %v512_v54 = vpop.f32.mrf.mxu0 }
 0x12e   :  { %v569_v30 = vpop.f32.mrf.mxu1  ;;  %v513_v14 = vadd.f32 %v512_v54, %v139_v59  ;;  %v580_v22 = vmax.f32 %v511_v12, 0.0 }
 0x12f   :  { %862 = vpow2.f32 %v750_v28  ;;  %v751_v32 = vmul.f32 -1.442695, %v566_v29  ;;  %v570_v33 = vadd.f32 %v569_v30, %v143_v17  ;;  %v516_v61 = vpop.f32.mrf.mxu0 }
 0x130   :  { %v571_v34 = vpop.f32.mrf.mxu1  ;;  %v517_v16 = vadd.f32 %v516_v61, %v135_v51  ;;  %v581_v24 = vmax.f32 %v513_v14, 0.0 }
 0x131   :  { %864 = vpow2.f32 %v751_v32  ;;  %v752_v35 = vmul.f32 -1.442695, %v570_v33  ;;  %v572_v36 = vadd.f32 %v571_v34, %v147_v18  ;;  %v518_v10 = vpop.f32.mrf.mxu0  ;;  %v636_v33 = vsub.f32 %v580_v22, %v1025_v63 }
 0x132   :  { %v573_v37 = vpop.f32.mrf.mxu1  ;;  %v582_v25 = vmax.f32 %v517_v16, 0.0  ;;  %v519_v28 = vadd.f32 %v518_v10, %v139_v59 }
 0x133   :  { %866 = vpow2.f32 %v752_v35  ;;  %v753_v41 = vmul.f32 -1.442695, %v572_v36  ;;  %v574_v42 = vadd.f32 %v573_v37, %v143_v17  ;;  %v520_v20 = vpop.f32.mrf.mxu0  ;;  %v637_v36 = vsub.f32 %v581_v24, %v1019_v39 }
 0x134   :  { %v575_v43 = vpop.f32.mrf.mxu1  ;;  %v521_v34 = vadd.f32 %v520_v20, %v135_v51  ;;  %v638_v37 = vsub.f32 %v582_v25, %v1035_v8 }
 0x135   :  { %868 = vpow2.f32 %v753_v41  ;;  %v754_v44 = vmul.f32 -1.442695, %v574_v42  ;;  %v576_v45 = vadd.f32 %v575_v43, %v147_v18  ;;  %v579_v18 = vmax.f32 %v509_v6, 0.0  ;;  %v522_v30 = vpop.f32.mrf.mxu0 }
 0x136   :  { %v583_v42 = vmax.f32 %v519_v28, 0.0  ;;  %v523_v43 = vadd.f32 %v522_v30, %v139_v59  ;;  %v584_v46 = vmax.f32 %v521_v34, 0.0 }
 0x137   :  { %870 = vpow2.f32 %v754_v44  ;;  %v755_v48 = vmul.f32 -1.442695, %v576_v45  ;;  %v635_v27 = vsub.f32 %v579_v18, %v1017_v38 }
 0x138   :  { %v859_v49 = vpop.eup %858  ;;  %v585_v51 = vmax.f32 %v523_v43, 0.0  ;;  %v640_v54 = vsub.f32 %v584_v46, %v1037_v9 }
 0x139   :  { %v610_v50 = vadd.f32 1.0, %v859_v49  ;;  %872 = vpow2.f32 %v755_v48 }
 0x13a   :  { %v861_v53 = vpop.eup %860 }
 0x13b   :  { %874 = vrcp.f32 %v610_v50  ;;  %v611_v55 = vadd.f32 1.0, %v861_v53  ;;  %v639_v50 = vsub.f32 %v583_v42, %v1027_v1 }
 0x13c   :  { %v863_v56 = vpop.eup %862 }
 0x13d   :  { %876 = vrcp.f32 %v611_v55  ;;  %v612_v57 = vadd.f32 1.0, %v863_v56 }
 0x13e   :  { %v865_v60 = vpop.eup %864 }
 0x13f   :  { %878 = vrcp.f32 %v612_v57  ;;  %v613_v0 = vadd.f32 1.0, %v865_v60  ;;  %v641_v57 = vsub.f32 %v585_v51, %v1029_v2 }
 0x140   :  { %v867_v3 = vpop.eup %866 }
 0x141   :  { %880 = vrcp.f32 %v613_v0  ;;  %v614_v4 = vadd.f32 1.0, %v867_v3 }
 0x142   :  { %v869_v7 = vpop.eup %868 }
 0x143   :  { %882 = vrcp.f32 %v614_v4  ;;  %v615_v11 = vadd.f32 1.0, %v869_v7 }
 0x144   :  { %v871_v13 = vpop.eup %870 }
 0x145   :  { %884 = vrcp.f32 %v615_v11  ;;  %v616_v17 = vadd.f32 1.0, %v871_v13 }
 0x146   :  { %v873_v19 = vpop.eup %872 }
 0x147   :  { %886 = vrcp.f32 %v616_v17  ;;  %v617_v21 = vadd.f32 1.0, %v873_v19 }
 0x148   :  { %v875_v23 = vpop.eup %874 }
 0x149   :  { %888 = vrcp.f32 %v617_v21  ;;  %v642_v26 = vmul.f32 %v875_v23, %v634_v15 }
 0x14a   :  { %v877_v29 = vpop.eup %876 }
 0x14b   :  { %v650_v31 = vadd.f32 %v642_v26, %v1023_v62  ;;  %v643_v32 = vmul.f32 %v877_v29, %v635_v27 }
 0x14c   :  { %v879_v35 = vpop.eup %878 }
 0x14d   :  { %658 = vst [vmem:[#allocation8] sm:$0xff] %v650_v31  ;;  %v651_v40 = vadd.f32 %v643_v32, %v1017_v38  ;;  %v644_v41 = vmul.f32 %v879_v35, %v636_v33 }
 0x14e   :  { %v881_v44 = vpop.eup %880 }
 0x14f   :  { %659 = vst [vmem:[#allocation8 + $0x8] sm:$0xff] %v651_v40  ;;  %v652_v45 = vadd.f32 %v644_v41, %v1025_v63  ;;  %v645_v62 = vmul.f32 %v881_v44, %v637_v36 }
 0x150   :  { %v883_v47 = vpop.eup %882 }
 0x151   :  { %660 = vst [vmem:[#allocation8 + $0x10] sm:$0xff] %v652_v45  ;;  %v653_v48 = vadd.f32 %v645_v62, %v1019_v39  ;;  %v646_v49 = vmul.f32 %v883_v47, %v638_v37 }
 0x152   :  { %v885_v52 = vpop.eup %884 }
 0x153   :  { %661 = vst [vmem:[#allocation8 + $0x18] sm:$0xff] %v653_v48  ;;  %v654_v38 = vadd.f32 %v646_v49, %v1035_v8  ;;  %v647_v53 = vmul.f32 %v885_v52, %v639_v50 }
 0x154   :  { %v887_v55 = vpop.eup %886 }
 0x155   :  { %662 = vst [vmem:[#allocation8 + $0x20] sm:$0xff] %v654_v38  ;;  %v655_v63 = vadd.f32 %v647_v53, %v1027_v1  ;;  %v648_v56 = vmul.f32 %v887_v55, %v640_v54 }
 0x156   :  { %v889_v58 = vpop.eup %888 }
 0x157   :  { %663 = vst [vmem:[#allocation8 + $0x28] sm:$0xff] %v655_v63  ;;  %v656_v39 = vadd.f32 %v648_v56, %v1037_v9  ;;  %v649_v59 = vmul.f32 %v889_v58, %v641_v57 }
 0x159   :  { %664 = vst [vmem:[#allocation8 + $0x30] sm:$0xff] %v656_v39  ;;  %v657_v8 = vadd.f32 %v649_v59, %v1029_v2 }
 0x15b   :  { %665 = vst [vmem:[#allocation8 + $0x38] sm:$0xff] %v657_v8 }
 0x15c   :  { %961 = shalt.err (!%p958_p5)
}
 0x15d   :  { %677 = dma.vmem_to_hbm [thread:$0]  %s672_s2, 1024, %s1066_s3, [#allocation4], %s978_s17, %s978_s17, %s979_s18  }
 0x15e   :  { %974 = dma.done.wait [#allocation4], 1024  }
 0x15f   :  { %975 = vsyncadd [#allocation4], 4294966272 }
 0x160   :  { %681 = vsyncpa [#allocation3], 1 }
 0x161   :  { %682 = vsyncpa [#allocation6], 1 }
 0x162   :  { %683 = vsyncpa [#allocation4], 1 }

</bundles_post_ra>
